<compile_context>
chip_gen: v7x
topology: tpu7x:2x2x1
jax: 0.10.0
libtpu: 0.0.40
codegen_flags: <defaults>
</compile_context>

<pallas_src>
import dataclasses
import functools
import math
import time

import jax
import jax.numpy as jnp
from jax.experimental import pallas as pl
from jax.experimental.pallas import tpu as pltpu

_INV_SQRT2 = 1.0 / math.sqrt(2.0)


# --------------------------------------------------------------------------- #
# Generation-aware tiling configuration
# --------------------------------------------------------------------------- #
@dataclasses.dataclass(frozen=True)
class _HwConfig:
    tr_max: int       # max sublane tile over rows = B*C
    tc_max: int       # max lane tile over the downsampled length L//2
    vmem_limit: int   # scoped VMEM limit handed to Mosaic
    two_cores: bool   # v7x: 2 TensorCores -> keep the grid >= 2 blocks


_HW_CONFIG = None


def _hw_config():
    global _HW_CONFIG
    if _HW_CONFIG is not None:
        return _HW_CONFIG
    kind = ""
    try:
        kind = jax.devices()[0].device_kind.lower()
    except Exception:
        pass
    vmem = None
    try:
        vmem = int(pltpu.get_tpu_info().vmem_capacity_bytes)
    except Exception:
        pass
    two_cores = "v7" in kind
    big_vmem = (vmem is not None and vmem >= 100 * 1024 * 1024) or any(
        g in kind for g in ("v4", "v5", "v6"))
    if big_vmem and not two_cores:
        # v4 / v5e / v6e: 128 MiB physical VMEM -> wider lane tiles, fewer
        # grid steps (amortize ~0.35 us/step), still well under the limit.
        cfg = _HwConfig(tr_max=256, tc_max=2048,
                        vmem_limit=64 * 1024 * 1024, two_cores=False)
    else:
        # v7x (64 MiB VMEM per TC) or unknown: ~8 MiB per-step footprint.
        cfg = _HwConfig(tr_max=256, tc_max=1024,
                        vmem_limit=32 * 1024 * 1024, two_cores=two_cores)
    _HW_CONFIG = cfg
    return cfg


def _sublane_align(dtype):
    # (8,128) tile for 32-bit; sub-32-bit dtypes pack along sublanes:
    # 16 for bf16/f16, 32 for int8/fp8.
    return max(8, 256 // (jnp.dtype(dtype).itemsize * 8))


def _pick_block(dim, max_block, align):
    """Largest tile <= max_block that is a multiple of `align`; full dim if small.

    Full-dim blocks are always legal even when unaligned.  Grids use pl.cdiv,
    so edge blocks are clipped by Pallas (safe: the op is purely element-wise).
    """
    if dim <= align:
        return dim
    return min(max_block, (dim // align) * align)


def _tiles(rows, half, out_dtype, cfg):
    align_r = _sublane_align(out_dtype)
    tr = _pick_block(rows, cfg.tr_max, align_r)
    tc = _pick_block(half, cfg.tc_max, 128)
    if cfg.two_cores and pl.cdiv(rows, tr) == 1 and pl.cdiv(half, tc) == 1:
        # v7x megacore: make sure there are >= 2 grid blocks so both
        # TensorCores get work (split rows, else the lane axis).
        rows_half = -(-rows // 2)
        cand = -(-rows_half // align_r) * align_r
        if 0 < cand < rows:
            tr = cand
        else:
            cols_half = -(-half // 2)
            cand_c = -(-cols_half // 128) * 128
            if 0 < cand_c < half:
                tc = cand_c
    return tr, tc


def _compiler_params(cfg, n_inputs, fuse_inputs=False):
    kwargs = dict(dimension_semantics=("parallel", "parallel"),
                  vmem_limit_bytes=cfg.vmem_limit)
    if fuse_inputs:
        kwargs["allow_input_fusion"] = [True] * n_inputs
    return pltpu.CompilerParams(**kwargs)


def _cost(rows, half, itemsize):
    # Pure HBM-streaming op: read x once, write low+high once.
    return pl.CostEstimate(flops=4 * rows * half, transcendentals=0,
                           bytes_accessed=4 * rows * half * itemsize)


# --------------------------------------------------------------------------- #
# Kernels
# --------------------------------------------------------------------------- #
def _butterfly(e, o, low_ref, high_ref):
    # Haar analysis butterfly, f32 accumulate, cast on store.
    e = e.astype(jnp.float32)
    o = o.astype(jnp.float32)
    low_ref[...] = ((e + o) * _INV_SQRT2).astype(low_ref.dtype)
    high_ref[...] = ((o - e) * _INV_SQRT2).astype(high_ref.dtype)


def _fused_kernel(x_ref, low_ref, high_ref, *, mode):
    """x_ref: (TR, 2*TC) interleaved tile; de-interleave in VMEM, butterfly."""
    tc = low_ref.shape[-1]
    if mode == "ref_stride":
        e = x_ref[:, pl.ds(0, tc, stride=2)]
        o = x_ref[:, pl.ds(1, tc, stride=2)]
    else:  # "value_stride"
        xv = x_ref[...]
        e = xv[:, 0::2]
        o = xv[:, 1::2]
    _butterfly(e, o, low_ref, high_ref)


def _packed_bf16_kernel(x_ref, low_ref, high_ref):
    """x_ref: (TR, TC) uint32; each lane holds one (even, odd) bf16 pair.

    Split with shift/mask (pure VPU) — no cross-lane shuffle, no XLU.  bf16 ->
    f32 promotion is exact: put the bf16 bits in the high half of a u32 and
    reinterpret (same-width bitcast).
    """
    xv = x_ref[...]
    even = pltpu.bitcast(xv << 16, jnp.float32)                    # low 16 bits
    odd = pltpu.bitcast(xv & jnp.uint32(0xFFFF0000), jnp.float32)  # high 16 bits
    low_ref[...] = ((even + odd) * _INV_SQRT2).astype(low_ref.dtype)
    high_ref[...] = ((odd - even) * _INV_SQRT2).astype(high_ref.dtype)


def _split_kernel(even_ref, odd_ref, low_ref, high_ref):
    """Fallback kernel: even/odd phases already split by XLA in the wrapper."""
    _butterfly(even_ref[...], odd_ref[...], low_ref, high_ref)


# --------------------------------------------------------------------------- #
# pallas_call builders (each takes the 2-D x2 and returns 2-D (low, high))
# --------------------------------------------------------------------------- #
def _fused_call(x2, *, mode, cfg):
    rows, width = x2.shape
    half = width // 2
    tr, tc = _tiles(rows, half, x2.dtype, cfg)
    out_spec = pl.BlockSpec((tr, tc), lambda i, j: (i, j))
    return pl.pallas_call(
        functools.partial(_fused_kernel, mode=mode),
        out_shape=(jax.ShapeDtypeStruct((rows, half), x2.dtype),) * 2,
        grid=(pl.cdiv(rows, tr), pl.cdiv(half, tc)),
        in_specs=[pl.BlockSpec((tr, 2 * tc), lambda i, j: (i, j))],
        out_specs=(out_spec, out_spec),
        compiler_params=_compiler_params(cfg, 1),
        cost_estimate=_cost(rows, half, x2.dtype.itemsize),
    )(x2)


def _packed_bf16_call(x2, *, cfg):
    rows, width = x2.shape
    half = width // 2
    # Contiguity-preserving reinterpret: each adjacent (even, odd) bf16 pair
    # becomes one uint32 word, so the kernel loads contiguously.
    x32 = jax.lax.bitcast_convert_type(
        x2[:, : 2 * half].reshape(rows, half, 2), jnp.uint32)
    tr, tc = _tiles(rows, half, x2.dtype, cfg)
    spec = pl.BlockSpec((tr, tc), lambda i, j: (i, j))
    return pl.pallas_call(
        _packed_bf16_kernel,
        out_shape=(jax.ShapeDtypeStruct((rows, half), x2.dtype),) * 2,
        grid=(pl.cdiv(rows, tr), pl.cdiv(half, tc)),
        in_specs=[spec],
        out_specs=(spec, spec),
        compiler_params=_compiler_params(cfg, 1),
        cost_estimate=_cost(rows, half, x2.dtype.itemsize),
    )(x32)


def _unfused_call(x2, *, cfg, fuse_inputs):
    rows, width = x2.shape
    half = width // 2
    # Even/odd phases split by XLA; with allow_input_fusion the strided slices
    # can be fused into the pallas_call input pipeline (no HBM materialization).
    xr = x2[:, : 2 * half].reshape(rows, half, 2)
    even = xr[..., 0]
    odd = xr[..., 1]
    tr, tc = _tiles(rows, half, x2.dtype, cfg)
    spec = pl.BlockSpec((tr, tc), lambda i, j: (i, j))
    return pl.pallas_call(
        _split_kernel,
        out_shape=(jax.ShapeDtypeStruct((rows, half), x2.dtype),) * 2,
        grid=(pl.cdiv(rows, tr), pl.cdiv(half, tc)),
        in_specs=[spec, spec],
        out_specs=(spec, spec),
        compiler_params=_compiler_params(cfg, 2, fuse_inputs=fuse_inputs),
        cost_estimate=_cost(rows, half, x2.dtype.itemsize),
    )(even, odd)


# --------------------------------------------------------------------------- #
# Perf-aware implementation selection (cached per shape/dtype/device kind):
# compile + numerically verify + time (min-of-N) every candidate, pick fastest.
# --------------------------------------------------------------------------- #
def _reference_2d(x2):
    rows, width = x2.shape
    half = width // 2
    pairs = x2[:, : 2 * half]
    e = pairs[:, 0::2].astype(jnp.float32)
    o = pairs[:, 1::2].astype(jnp.float32)
    return (((e + o) * _INV_SQRT2).astype(x2.dtype),
            ((o - e) * _INV_SQRT2).astype(x2.dtype))


_IMPL_CACHE = {}


def _time_candidate(fn, args, n_runs=5):
    out = fn(*args)
    jax.block_until_ready(out)            # compile + warm-up
    best = math.inf
    for _ in range(n_runs):
        t0 = time.perf_counter()
        out = fn(*args)
        jax.block_until_ready(out)
        best = min(best, time.perf_counter() - t0)
    return best, out


def _get_impl(rows, width, dtype):
    cfg = _hw_config()
    try:
        dev_kind = jax.devices()[0].device_kind
    except Exception:
        dev_kind = "unknown"
    key = (rows, width, jnp.dtype(dtype).name, dev_kind, cfg)
    impl = _IMPL_CACHE.get(key)
    if impl is not None:
        return impl

    # Deterministic probe input at the real shape.
    test = ((jnp.arange(rows * width, dtype=jnp.float32) % 7.0) - 3.0)
    test = test.reshape(rows, width).astype(dtype)
    want_low, want_high = _reference_2d(test)
    tol = 1e-5 if jnp.dtype(dtype) == jnp.dtype(jnp.float32) else 2e-2

    candidates = []
    if jnp.dtype(dtype) == jnp.dtype(jnp.bfloat16):
        candidates.append(jax.jit(functools.partial(_packed_bf16_call, cfg=cfg)))
    for mode in ("ref_stride", "value_stride"):
        candidates.append(jax.jit(functools.partial(_fused_call, mode=mode, cfg=cfg)))
    candidates.append(jax.jit(functools.partial(_unfused_call, cfg=cfg,
                                                fuse_inputs=True)))

    best_fn, best_t = None, math.inf
    for fn in candidates:
        try:
            t, (low, high) = _time_candidate(fn, (test,))
        except Exception:
            continue   # this variant does not lower/run on this build -> skip
        ok = (bool(jnp.allclose(low, want_low, atol=tol, rtol=tol))
              and bool(jnp.allclose(high, want_high, atol=tol, rtol=tol)))
        if ok and t < best_t:
            best_fn, best_t = fn, t

    if best_fn is None:
        # Last resort: plain unfused kernel (unit-stride everywhere, always lowers).
        best_fn = jax.jit(functools.partial(_unfused_call, cfg=cfg,
                                            fuse_inputs=False))

    _IMPL_CACHE[key] = best_fn
    return best_fn


# --------------------------------------------------------------------------- #
# Public forward
# --------------------------------------------------------------------------- #
def _fold_factor(rows, half):
    """Fold k rows onto the lane axis when L//2 is narrow so output stores are
    lane-dense instead of masked partial stores.  Valid because each row has
    even length 2*half, so even/odd parity is preserved across the fold."""
    if half >= 128 or rows <= 1:
        return 1
    best = 1
    for k in range(1, rows + 1):
        if rows % k:
            continue
        kh = k * half
        if kh > 4096:
            break
        best = k
        if kh % 128 == 0 and kh >= 1024:
            break
    return best


def haar_dwt_forward(x):
    """x: (B, C, L) -> (low, high), each (B, C, L // 2).  Matches HaarDWT.forward."""
    B, C, L = x.shape
    half = L // 2                 # odd L truncated (valid stride-2 conv length)
    if half == 0:
        z = jnp.zeros((B, C, 0), dtype=x.dtype)
        return z, z
    rows = B * C

    if L == 2 * half:
        # Even L: free reshape; fold rows onto lanes when L//2 is narrow.
        k = _fold_factor(rows, half)
        x2 = x.reshape(rows // k, k * L)
    elif half >= 128:
        # Odd L, wide: no slice copy — the kernel grid never reads the trailing
        # element (lane tiles are multiples of 128, so blocks stay legal).
        x2 = x.reshape(rows, L)
    else:
        # Odd L, narrow: slicing off the trailing element is negligible here.
        x2 = x[..., : 2 * half].reshape(rows, 2 * half)

    impl = _get_impl(x2.shape[0], x2.shape[1], x2.dtype)
    low, high = impl(x2)
    return low.reshape(B, C, half), high.reshape(B, C, half)


def _haar_dwt_reference(x):
    """Plain-JAX reference matching F.conv1d(x, lp/hp, stride=2, groups=C)."""
    half = x.shape[-1] // 2
    pairs = x[..., : 2 * half]
    e = pairs[..., 0::2].astype(jnp.float32)
    o = pairs[..., 1::2].astype(jnp.float32)
    return (((e + o) * _INV_SQRT2).astype(x.dtype),
            ((o - e) * _INV_SQRT2).astype(x.dtype))


if __name__ == "__main__":
    # (B, C, L) consistent with the module's forward contract.
    B, C, L = 2, 4, 16
    key = jax.random.PRNGKey(0)
    x = jax.random.normal(key, (B, C, L), dtype=jnp.float32)

    low, high = haar_dwt_forward(x)
    jax.block_until_ready((low, high))

    ref_low, ref_high = _haar_dwt_reference(x)
    assert low.shape == (B, C, L // 2) and high.shape == (B, C, L // 2)
    assert jnp.allclose(low, ref_low, atol=1e-5, rtol=1e-5)
    assert jnp.allclose(high, ref_high, atol=1e-5, rtol=1e-5)

    # Also exercise the bf16 packed bit-split path at a small shape.
    xb = jax.random.normal(jax.random.PRNGKey(1), (2, 4, 64), dtype=jnp.bfloat16)
    lb, hb = haar_dwt_forward(xb)
    jax.block_until_ready((lb, hb))
    rlb, rhb = _haar_dwt_reference(xb)
    assert lb.shape == (2, 4, 32) and hb.shape == (2, 4, 32)
    assert jnp.allclose(lb.astype(jnp.float32), rlb.astype(jnp.float32),
                        atol=2e-2, rtol=2e-2)
    assert jnp.allclose(hb.astype(jnp.float32), rhb.astype(jnp.float32),
                        atol=2e-2, rtol=2e-2)

    print("KERNEL_OK")
</pallas_src>

<mosaic_0001>
module attributes {stable_mosaic.version = 11 : i64} {
  func.func @_fused_kernel(%arg0: i32, %arg1: i32, %arg2: memref<1x128xf32, #tpu.memory_space<vmem>>, %arg3: memref<1x64xf32, #tpu.memory_space<vmem>>, %arg4: memref<1x64xf32, #tpu.memory_space<vmem>>) attributes {dimension_semantics = [#tpu.dimension_semantics<parallel>, #tpu.dimension_semantics<parallel>], iteration_bounds = array<i64: 1, 1>, scalar_prefetch = 0 : i64, scratch_operands = 0 : i64, tpu.core_type = #tpu.core_type<tc>, window_params = [{transform_indices = @transform_0, window_bounds = array<i64: 1, 128>}, {transform_indices = @transform_1, window_bounds = array<i64: 1, 64>}, {transform_indices = @transform_2, window_bounds = array<i64: 1, 64>}]} {
    %c0 = arith.constant 0 : index
    %c0_0 = arith.constant 0 : index
    %0 = tpu.strided_load %arg2[%c0, %c0_0] {strides = array<i32: 1, 2>} : memref<1x128xf32, #tpu.memory_space<vmem>>, vector<1x64xf32>
    %c0_1 = arith.constant 0 : index
    %c1 = arith.constant 1 : index
    %1 = tpu.strided_load %arg2[%c0_1, %c1] {strides = array<i32: 1, 2>} : memref<1x128xf32, #tpu.memory_space<vmem>>, vector<1x64xf32>
    %2 = arith.addf %0, %1 : vector<1x64xf32>
    %cst = arith.constant 0.707106769 : f32
    %3 = vector.broadcast %cst : f32 to vector<1x64xf32>
    %4 = arith.mulf %2, %3 : vector<1x64xf32>
    %c0_2 = arith.constant 0 : index
    %c0_3 = arith.constant 0 : index
    %5 = vector.load %arg3[%c0_2, %c0_3] : memref<1x64xf32, #tpu.memory_space<vmem>>, vector<1x64xf32>
    tpu.vector_store %arg3[%c0_2, %c0_3], %4 {strides = array<i32>} : memref<1x64xf32, #tpu.memory_space<vmem>>, vector<1x64xf32>,
    %6 = arith.subf %1, %0 : vector<1x64xf32>
    %cst_4 = arith.constant 0.707106769 : f32
    %7 = vector.broadcast %cst_4 : f32 to vector<1x64xf32>
    %8 = arith.mulf %6, %7 : vector<1x64xf32>
    %c0_5 = arith.constant 0 : index
    %c0_6 = arith.constant 0 : index
    %9 = vector.load %arg4[%c0_5, %c0_6] : memref<1x64xf32, #tpu.memory_space<vmem>>, vector<1x64xf32>
    tpu.vector_store %arg4[%c0_5, %c0_6], %8 {strides = array<i32>} : memref<1x64xf32, #tpu.memory_space<vmem>>, vector<1x64xf32>,
    return
  }
  func.func @transform_0(%arg0: i32, %arg1: i32) -> (i32, i32) {
    %c0_i32 = arith.constant 0 : i32
    return %arg0, %arg1 : i32, i32
  }
  func.func @transform_1(%arg0: i32, %arg1: i32) -> (i32, i32) {
    %c0_i32 = arith.constant 0 : i32
    return %arg0, %arg1 : i32, i32
  }
  func.func @transform_2(%arg0: i32, %arg1: i32) -> (i32, i32) {
    %c0_i32 = arith.constant 0 : i32
    return %arg0, %arg1 : i32, i32
  }
}

module attributes {stable_mosaic.version = 11 : i64} {
  func.func @_split_kernel(%arg0: i32, %arg1: i32, %arg2: memref<1x64xf32, #tpu.memory_space<vmem>>, %arg3: memref<1x64xf32, #tpu.memory_space<vmem>>, %arg4: memref<1x64xf32, #tpu.memory_space<vmem>>, %arg5: memref<1x64xf32, #tpu.memory_space<vmem>>) attributes {dimension_semantics = [#tpu.dimension_semantics<parallel>, #tpu.dimension_semantics<parallel>], iteration_bounds = array<i64: 1, 1>, scalar_prefetch = 0 : i64, scratch_operands = 0 : i64, tpu.core_type = #tpu.core_type<tc>, window_params = [{transform_indices = @transform_0, window_bounds = array<i64: 1, 64>}, {transform_indices = @transform_1, window_bounds = array<i64: 1, 64>}, {transform_indices = @transform_2, window_bounds = array<i64: 1, 64>}, {transform_indices = @transform_3, window_bounds = array<i64: 1, 64>}]} {
    %c0 = arith.constant 0 : index
    %c0_0 = arith.constant 0 : index
    %0 = vector.load %arg2[%c0, %c0_0] : memref<1x64xf32, #tpu.memory_space<vmem>>, vector<1x64xf32>
    %c0_1 = arith.constant 0 : index
    %c0_2 = arith.constant 0 : index
    %1 = vector.load %arg3[%c0_1, %c0_2] : memref<1x64xf32, #tpu.memory_space<vmem>>, vector<1x64xf32>
    %2 = arith.addf %0, %1 : vector<1x64xf32>
    %cst = arith.constant 0.707106769 : f32
    %3 = vector.broadcast %cst : f32 to vector<1x64xf32>
    %4 = arith.mulf %2, %3 : vector<1x64xf32>
    %c0_3 = arith.constant 0 : index
    %c0_4 = arith.constant 0 : index
    %5 = vector.load %arg4[%c0_3, %c0_4] : memref<1x64xf32, #tpu.memory_space<vmem>>, vector<1x64xf32>
    tpu.vector_store %arg4[%c0_3, %c0_4], %4 {strides = array<i32>} : memref<1x64xf32, #tpu.memory_space<vmem>>, vector<1x64xf32>,
    %6 = arith.subf %1, %0 : vector<1x64xf32>
    %cst_5 = arith.constant 0.707106769 : f32
    %7 = vector.broadcast %cst_5 : f32 to vector<1x64xf32>
    %8 = arith.mulf %6, %7 : vector<1x64xf32>
    %c0_6 = arith.constant 0 : index
    %c0_7 = arith.constant 0 : index
    %9 = vector.load %arg5[%c0_6, %c0_7] : memref<1x64xf32, #tpu.memory_space<vmem>>, vector<1x64xf32>
    tpu.vector_store %arg5[%c0_6, %c0_7], %8 {strides = array<i32>} : memref<1x64xf32, #tpu.memory_space<vmem>>, vector<1x64xf32>,
    return
  }
  func.func @transform_0(%arg0: i32, %arg1: i32) -> (i32, i32) {
    %c0_i32 = arith.constant 0 : i32
    return %arg0, %arg1 : i32, i32
  }
  func.func @transform_1(%arg0: i32, %arg1: i32) -> (i32, i32) {
    %c0_i32 = arith.constant 0 : i32
    return %arg0, %arg1 : i32, i32
  }
  func.func @transform_2(%arg0: i32, %arg1: i32) -> (i32, i32) {
    %c0_i32 = arith.constant 0 : i32
    return %arg0, %arg1 : i32, i32
  }
  func.func @transform_3(%arg0: i32, %arg1: i32) -> (i32, i32) {
    %c0_i32 = arith.constant 0 : i32
    return %arg0, %arg1 : i32, i32
  }
}

module attributes {stable_mosaic.version = 11 : i64} {
  func.func @_split_kernel(%arg0: i32, %arg1: i32, %arg2: memref<1x64xf32, #tpu.memory_space<vmem>>, %arg3: memref<1x64xf32, #tpu.memory_space<vmem>>, %arg4: memref<1x64xf32, #tpu.memory_space<vmem>>, %arg5: memref<1x64xf32, #tpu.memory_space<vmem>>) attributes {dimension_semantics = [#tpu.dimension_semantics<parallel>, #tpu.dimension_semantics<parallel>], iteration_bounds = array<i64: 1, 1>, scalar_prefetch = 0 : i64, scratch_operands = 0 : i64, tpu.core_type = #tpu.core_type<tc>, window_params = [{transform_indices = @transform_0, window_bounds = array<i64: 1, 64>}, {transform_indices = @transform_1, window_bounds = array<i64: 1, 64>}, {transform_indices = @transform_2, window_bounds = array<i64: 1, 64>}, {transform_indices = @transform_3, window_bounds = array<i64: 1, 64>}]} {
    %c0 = arith.constant 0 : index
    %c0_0 = arith.constant 0 : index
    %0 = vector.load %arg2[%c0, %c0_0] : memref<1x64xf32, #tpu.memory_space<vmem>>, vector<1x64xf32>
    %c0_1 = arith.constant 0 : index
    %c0_2 = arith.constant 0 : index
    %1 = vector.load %arg3[%c0_1, %c0_2] : memref<1x64xf32, #tpu.memory_space<vmem>>, vector<1x64xf32>
    %2 = arith.addf %0, %1 : vector<1x64xf32>
    %cst = arith.constant 0.707106769 : f32
    %3 = vector.broadcast %cst : f32 to vector<1x64xf32>
    %4 = arith.mulf %2, %3 : vector<1x64xf32>
    %c0_3 = arith.constant 0 : index
    %c0_4 = arith.constant 0 : index
    %5 = vector.load %arg4[%c0_3, %c0_4] : memref<1x64xf32, #tpu.memory_space<vmem>>, vector<1x64xf32>
    tpu.vector_store %arg4[%c0_3, %c0_4], %4 {strides = array<i32>} : memref<1x64xf32, #tpu.memory_space<vmem>>, vector<1x64xf32>,
    %6 = arith.subf %1, %0 : vector<1x64xf32>
    %cst_5 = arith.constant 0.707106769 : f32
    %7 = vector.broadcast %cst_5 : f32 to vector<1x64xf32>
    %8 = arith.mulf %6, %7 : vector<1x64xf32>
    %c0_6 = arith.constant 0 : index
    %c0_7 = arith.constant 0 : index
    %9 = vector.load %arg5[%c0_6, %c0_7] : memref<1x64xf32, #tpu.memory_space<vmem>>, vector<1x64xf32>
    tpu.vector_store %arg5[%c0_6, %c0_7], %8 {strides = array<i32>} : memref<1x64xf32, #tpu.memory_space<vmem>>, vector<1x64xf32>,
    return
  }
  func.func @transform_0(%arg0: i32, %arg1: i32) -> (i32, i32) {
    %c0_i32 = arith.constant 0 : i32
    return %arg0, %arg1 : i32, i32
  }
  func.func @transform_1(%arg0: i32, %arg1: i32) -> (i32, i32) {
    %c0_i32 = arith.constant 0 : i32
    return %arg0, %arg1 : i32, i32
  }
  func.func @transform_2(%arg0: i32, %arg1: i32) -> (i32, i32) {
    %c0_i32 = arith.constant 0 : i32
    return %arg0, %arg1 : i32, i32
  }
  func.func @transform_3(%arg0: i32, %arg1: i32) -> (i32, i32) {
    %c0_i32 = arith.constant 0 : i32
    return %arg0, %arg1 : i32, i32
  }
}

</mosaic_0001>

<bundles_post_ra>
// kernel: _unfused_call.2
= control target key start
LH: loop header
LB: loop body
LE: loop exit
PB: predicated region body
PF: predicated region fallthrough
CT: control target
= control target key end

     0   :  { %9 = vsyncpa [#allocation3], 0  ;;  %s168_s0 = inlined_call_operand.vmem [shape: f32[64], index: 0, kind: input, shape index: {}]   ;;  %s169_s1 = inlined_call_operand.vmem [shape: f32[64], index: 1, kind: input, shape index: {}]   ;;  %s170_s2 = inlined_call_operand.hbm [shape: f32[1,64], index: 2, kind: output, shape index: {0}]   ;;  %s171_s3 = inlined_call_operand.hbm [shape: f32[1,64], index: 3, kind: output, shape index: {1}]  }
   0x1   :  { %v15_v0 = vld [vmem:[%s169_s1] sm:$0x1] }
   0x2   :  { %v18_v1 = vld [vmem:[%s168_s0] sm:$0x1]  ;;  %17 = vst [vmem:[#allocation6] sm:$0x1] %v15_v0 }
   0x3   :  { %20 = vst [vmem:[#allocation7] sm:$0x1] %v18_v1 }
   0x4   :  { %10 = vsyncpa [#allocation5], 0  ;;  %s108_s16 = smov [#allocation2]   ;;  %s109_s18 = smov [#allocation4]   ;;  %vm25_vm0 = vcmask 516096  }
   0x5   :  { %s36_s17 = sshll.u32 %s108_s16, 4  ;;  %s46_s19 = sshll.u32 %s109_s18, 4  ;;  %s37_s17 = int_to_ptr.vmem [resolvable:$true] %s36_s17  ;;  %s136_s19 = int_to_ptr.vmem [resolvable:$true] %s46_s19 }
   0x6   :  { %s60_s0 = scalar_lea.vmem %s37_s17, 16  ;;  %s64_s1 = scalar_lea.vmem %s37_s17, 32 }
   0x7   :  { %p61_p0 = scmp.ne.s32.totalorder %s37_s17, %s60_s0  ;;  %p65_p1 = scmp.lt.s32.totalorder %s37_s17, %s37_s17 }
   0x8   :  { %p66_p2 = scmp.lt.s32.totalorder %s64_s1, %s60_s0 }
   0x9   :  { %v21_v2 = vld [vmem:[#allocation6] sm:$0x1] }
   0xa   :  { %v22_v3 = vld [vmem:[#allocation7] sm:$0x1]  ;;  %p67_p3 = por %p66_p2, %p65_p1 }
   0xb   :  { %v23_v4 = vadd.f32 %v22_v3, %v21_v2  ;;  %v27_v5 = vsub.f32 %v22_v3, %v21_v2 }
   0xc   :  { %p68_p4 = pnand %p67_p3, %p61_p0 }
   0xd   :  { %v24_v6 = vmul.f32 0.70710677, %v23_v4  ;;  %v28_v7 = vmul.f32 0.70710677, %v27_v5 }
   0xf   :  { %26 = vst.msk [vmem:[#allocation2] sm:$0x1] %vm25_vm0, %v24_v6  ;;  %29 = vst.msk [vmem:[#allocation4] sm:$0x1] %vm25_vm0, %v28_v7 }
  0x10   :  { %71 = shalt.err (!%p68_p4)
}
  0x11   :  { %s72_s22 = scalar_lea.hbm %s170_s2, 16 }
  0x12   :  { %p73_p5 = scmp.ne.s32.totalorder %s170_s2, %s72_s22  ;;  %p76_p6 = scmp.lt.u32.totalorder %s72_s22, %s170_s2 }
  0x14   :  { %p78_p7 = pnand %p76_p6, %p73_p5 }
  0x16   :  { %81 = shalt.err (!%p78_p7)
}
  0x17   :  { %39 = dma.vmem_to_hbm [thread:$0]  %s37_s17, 16, %s170_s2, [#allocation3]  }
  0x18   :  { %s82_s29 = scalar_lea.vmem %s136_s19, 16  ;;  %s86_s30 = scalar_lea.vmem %s136_s19, 32 }
  0x19   :  { %p83_p8 = scmp.ne.s32.totalorder %s136_s19, %s82_s29  ;;  %p87_p9 = scmp.lt.s32.totalorder %s136_s19, %s136_s19 }
  0x1a   :  { %p88_p10 = scmp.lt.s32.totalorder %s86_s30, %s82_s29 }
  0x1c   :  { %p89_p11 = por %p88_p10, %p87_p9 }
  0x1e   :  { %p90_p12 = pnand %p89_p11, %p83_p8 }
  0x20   :  { %93 = shalt.err (!%p90_p12)
}
  0x21   :  { %s94_s6 = scalar_lea.hbm %s171_s3, 16 }
  0x22   :  { %p95_p13 = scmp.ne.s32.totalorder %s171_s3, %s94_s6  ;;  %p98_p0 = scmp.lt.u32.totalorder %s94_s6, %s171_s3 }
  0x24   :  { %p100_p1 = pnand %p98_p0, %p95_p13 }
  0x26   :  { %103 = shalt.err (!%p100_p1)
}
  0x27   :  { %49 = dma.vmem_to_hbm [thread:$0]  %s136_s19, 16, %s171_s3, [#allocation5]  }
  0x28   :  { %104 = dma.done.wait [#allocation3], 16  }
  0x29   :  { %105 = vsyncadd [#allocation3], 4294967280 }
  0x2a   :  { %106 = dma.done.wait [#allocation5], 16  }
  0x2b   :  { %107 = vsyncadd [#allocation5], 4294967280 }
  0x2c   :  { %56 = vsyncpa [#allocation3], 1 }
  0x2d   :  { %57 = vsyncpa [#allocation5], 1 }

// kernel: _unfused_call.1
= control target key start
LH: loop header
LB: loop body
LE: loop exit
PB: predicated region body
PF: predicated region fallthrough
CT: control target
= control target key end

     0   :  { %9 = vsyncpa [#allocation3], 0  ;;  %s102_s16 = smov [#allocation2]   ;;  %s162_s0 = inlined_call_operand.vmem [shape: f32[1,64], index: 0, kind: input, shape index: {}]   ;;  %s163_s1 = inlined_call_operand.vmem [shape: f32[1,64], index: 1, kind: input, shape index: {}]   ;;  %s164_s2 = inlined_call_operand.hbm [shape: f32[1,64], index: 2, kind: output, shape index: {0}]   ;;  %s165_s3 = inlined_call_operand.hbm [shape: f32[1,64], index: 3, kind: output, shape index: {1}]  }
   0x1   :  { %v15_v0 = vld [vmem:[%s162_s0] sm:$0x1]  ;;  %s30_s17 = sshll.u32 %s102_s16, 4  ;;  %s31_s17 = int_to_ptr.vmem [resolvable:$true] %s30_s17 }
   0x2   :  { %v16_v1 = vld [vmem:[%s163_s1] sm:$0x1] }
   0x3   :  { %v17_v2 = vadd.f32 %v16_v1, %v15_v0  ;;  %v21_v3 = vsub.f32 %v16_v1, %v15_v0 }
   0x4   :  { %10 = vsyncpa [#allocation5], 0  ;;  %vm19_vm0 = vcmask 516096   ;;  %s103_s18 = smov [#allocation4]   ;;  %s54_s0 = scalar_lea.vmem %s31_s17, 16 }
   0x5   :  { %s40_s19 = sshll.u32 %s103_s18, 4  ;;  %v18_v4 = vmul.f32 0.70710677, %v17_v2  ;;  %v22_v5 = vmul.f32 0.70710677, %v21_v3  ;;  %p55_p0 = scmp.ne.s32.totalorder %s31_s17, %s54_s0  ;;  %s130_s19 = int_to_ptr.vmem [resolvable:$true] %s40_s19 }
   0x6   :  { %s58_s20 = scalar_lea.vmem %s31_s17, 32  ;;  %p59_p1 = scmp.lt.s32.totalorder %s31_s17, %s31_s17 }
   0x7   :  { %20 = vst.msk [vmem:[#allocation2] sm:$0x1] %vm19_vm0, %v18_v4  ;;  %23 = vst.msk [vmem:[#allocation4] sm:$0x1] %vm19_vm0, %v22_v5  ;;  %p60_p2 = scmp.lt.s32.totalorder %s58_s20, %s54_s0 }
   0x9   :  { %p61_p3 = por %p60_p2, %p59_p1 }
   0xb   :  { %p62_p4 = pnand %p61_p3, %p55_p0 }
   0xd   :  { %65 = shalt.err (!%p62_p4)
}
   0xe   :  { %s66_s22 = scalar_lea.hbm %s164_s2, 16 }
   0xf   :  { %p67_p5 = scmp.ne.s32.totalorder %s164_s2, %s66_s22  ;;  %p70_p6 = scmp.lt.u32.totalorder %s66_s22, %s164_s2 }
  0x11   :  { %p72_p7 = pnand %p70_p6, %p67_p5 }
  0x13   :  { %75 = shalt.err (!%p72_p7)
}
  0x14   :  { %33 = dma.vmem_to_hbm [thread:$0]  %s31_s17, 16, %s164_s2, [#allocation3]  }
  0x15   :  { %s76_s29 = scalar_lea.vmem %s130_s19, 16  ;;  %s80_s30 = scalar_lea.vmem %s130_s19, 32 }
  0x16   :  { %p77_p8 = scmp.ne.s32.totalorder %s130_s19, %s76_s29  ;;  %p81_p9 = scmp.lt.s32.totalorder %s130_s19, %s130_s19 }
  0x17   :  { %p82_p10 = scmp.lt.s32.totalorder %s80_s30, %s76_s29 }
  0x19   :  { %p83_p11 = por %p82_p10, %p81_p9 }
  0x1b   :  { %p84_p12 = pnand %p83_p11, %p77_p8 }
  0x1d   :  { %87 = shalt.err (!%p84_p12)
}
  0x1e   :  { %s88_s6 = scalar_lea.hbm %s165_s3, 16 }
  0x1f   :  { %p89_p13 = scmp.ne.s32.totalorder %s165_s3, %s88_s6  ;;  %p92_p0 = scmp.lt.u32.totalorder %s88_s6, %s165_s3 }
  0x21   :  { %p94_p1 = pnand %p92_p0, %p89_p13 }
  0x23   :  { %97 = shalt.err (!%p94_p1)
}
  0x24   :  { %43 = dma.vmem_to_hbm [thread:$0]  %s130_s19, 16, %s165_s3, [#allocation5]  }
  0x25   :  { %98 = dma.done.wait [#allocation3], 16  }
  0x26   :  { %99 = vsyncadd [#allocation3], 4294967280 }
  0x27   :  { %100 = dma.done.wait [#allocation5], 16  }
  0x28   :  { %101 = vsyncadd [#allocation5], 4294967280 }
  0x29   :  { %50 = vsyncpa [#allocation3], 1 }
  0x2a   :  { %51 = vsyncpa [#allocation5], 1 }

</bundles_post_ra>
